<compile_context>
chip_gen: v7x
topology: tpu7x:2x2x1
jax: 0.10.0
libtpu: 0.0.40
codegen_flags: <defaults>
</compile_context>

<pallas_src>
import jax
import jax.numpy as jnp
from jax.experimental import pallas as pl
from jax.experimental.pallas import tpu as pltpu


# ----------------------------------------------------------------------------
# Pallas kernels
# ----------------------------------------------------------------------------
def _gate_finalize(acc, c0, tH):
    """acc: (tB, 4*tH) f32 gate pre-activations stacked [f, i, o, g] on lanes."""
    f = acc[:, 0 * tH:1 * tH]
    i = acc[:, 1 * tH:2 * tH]
    o = acc[:, 2 * tH:3 * tH]
    g = acc[:, 3 * tH:4 * tH]
    c1 = jax.nn.sigmoid(f) * c0 + jax.nn.sigmoid(i) * jnp.tanh(g)
    h1 = jax.nn.sigmoid(o) * jnp.tanh(c1)
    return h1, c1


def _vd_lstm_train_kernel(comb_ref, mask_ref, w_ref, c0_ref,
                          h1_ref, c1_ref, acc_ref):
    """Grid point (i, j, k): i tiles B, j tiles H, k tiles the reduction K.

    comb_ref : (tB, tK)     f32   combined [h_0, input] tile
    mask_ref : (4, tB, tK)  bf16  0/1 keep masks, gate order [f, i, o, g]
    w_ref    : (4, tK, tH)  bf16  gate weights (keep_scale already folded in)
    c0_ref   : (tB, tH)     f32   previous cell state tile
    h1_ref, c1_ref : (tB, tH) f32 outputs
    acc_ref  : (tB, 4*tH)   f32   lane-dense gate accumulator (scratch)
    """
    k = pl.program_id(2)
    tH = h1_ref.shape[-1]

    @pl.when(k == 0)
    def _():
        acc_ref[...] = jnp.zeros_like(acc_ref)

    comb = comb_ref[...]                                  # (tB, tK) f32
    gates = []
    for gi in range(4):                                   # static unroll [f,i,o,g]
        # f32 elementwise masking, bf16 into the MXU, f32 accumulate.
        x_in = (comb * mask_ref[gi]).astype(jnp.bfloat16)
        gates.append(jnp.dot(x_in, w_ref[gi],
                             preferred_element_type=jnp.float32))
    acc_ref[...] += jnp.concatenate(gates, axis=-1)       # (tB, 4*tH) wide store

    @pl.when(k == pl.num_programs(2) - 1)
    def _():
        h1, c1 = _gate_finalize(acc_ref[...], c0_ref[...], tH)
        h1_ref[...] = h1.astype(h1_ref.dtype)
        c1_ref[...] = c1.astype(c1_ref.dtype)


def _vd_lstm_eval_kernel(comb_ref, w_ref, c0_ref, h1_ref, c1_ref, acc_ref):
    """Eval / no-dropout path: identical structure, no mask input at all."""
    k = pl.program_id(2)
    tH = h1_ref.shape[-1]

    @pl.when(k == 0)
    def _():
        acc_ref[...] = jnp.zeros_like(acc_ref)

    x_in = comb_ref[...].astype(jnp.bfloat16)             # shared by all gates
    gates = [jnp.dot(x_in, w_ref[gi], preferred_element_type=jnp.float32)
             for gi in range(4)]
    acc_ref[...] += jnp.concatenate(gates, axis=-1)

    @pl.when(k == pl.num_programs(2) - 1)
    def _():
        h1, c1 = _gate_finalize(acc_ref[...], c0_ref[...], tH)
        h1_ref[...] = h1.astype(h1_ref.dtype)
        c1_ref[...] = c1.astype(c1_ref.dtype)


# ----------------------------------------------------------------------------
# Wrapper
# ----------------------------------------------------------------------------
def _pick_tile(dim, target):
    """Use `target` (a multiple of the (8,128) tiling base) if it evenly
    divides `dim`; otherwise fall back to the full dimension."""
    if dim > target and dim % target == 0:
        return target
    return dim


def variational_dropout_lstm_cell(x, h0, c0, weights, masks, drop_out_rate,
                                  training=True, *,
                                  tb=256, th=256, tk=512,
                                  vmem_limit_bytes=48 * 1024 * 1024):
    """Forward pass matching VariationalDropoutLSTMCell.forward.

    x       : (B, input_size)
    h0, c0  : (B, hidden_size)
    weights : (4, input_size + hidden_size, hidden_size), gate order [f, i, o, g]
    masks   : (4, B, input_size + hidden_size) 0/1 keep masks, same gate order
              (ignored when not training or drop_out_rate == 0)
    Returns (h1, c1), both (B, hidden_size) float32.
    """
    B, H = h0.shape
    K = h0.shape[1] + x.shape[1]

    # torch.cat((h_0, input), 1): h first, then input.  Glue, not hot path.
    comb = jnp.concatenate([h0, x], axis=1).astype(jnp.float32)
    c0 = c0.astype(jnp.float32)

    use_mask = training and drop_out_rate > 0.0 and masks is not None
    if use_mask:
        keep_scale = 1.0 / (1.0 - drop_out_rate)
        # Fold the 1/(1-p) rescale into the weights: (x*m*s)@W == (x*m)@(s*W).
        w_eff = (weights.astype(jnp.float32) * keep_scale).astype(jnp.bfloat16)
        masks_eff = masks.astype(jnp.bfloat16)            # narrow HBM storage
    else:
        w_eff = weights.astype(jnp.bfloat16)
        masks_eff = None

    tB = _pick_tile(B, tb)      # multiple of 8   (or full B)
    tH = _pick_tile(H, th)      # multiple of 128 (or full H)
    tK = _pick_tile(K, tk)      # multiple of 128 (or full K)
    grid = (B // tB, H // tH, K // tK)

    comb_spec = pl.BlockSpec((tB, tK), lambda i, j, k: (i, k))
    w_spec = pl.BlockSpec((4, tK, tH), lambda i, j, k: (0, k, j))
    c0_spec = pl.BlockSpec((tB, tH), lambda i, j, k: (i, j))
    out_spec = pl.BlockSpec((tB, tH), lambda i, j, k: (i, j))

    if use_mask:
        kernel = _vd_lstm_train_kernel
        mask_spec = pl.BlockSpec((4, tB, tK), lambda i, j, k: (0, i, k))
        in_specs = [comb_spec, mask_spec, w_spec, c0_spec]
        operands = (comb, masks_eff, w_eff, c0)
    else:
        kernel = _vd_lstm_eval_kernel
        in_specs = [comb_spec, w_spec, c0_spec]
        operands = (comb, w_eff, c0)

    grid_spec = pltpu.PrefetchScalarGridSpec(
        num_scalar_prefetch=0,
        grid=grid,
        in_specs=in_specs,
        out_specs=[out_spec, out_spec],
        scratch_shapes=[pltpu.VMEM((tB, 4 * tH), jnp.float32)],
    )

    h1, c1 = pl.pallas_call(
        kernel,
        out_shape=(
            jax.ShapeDtypeStruct((B, H), jnp.float32),    # h_1
            jax.ShapeDtypeStruct((B, H), jnp.float32),    # c_1
        ),
        grid_spec=grid_spec,
        compiler_params=pltpu.CompilerParams(
            dimension_semantics=("parallel", "parallel", "arbitrary"),
            vmem_limit_bytes=vmem_limit_bytes,
        ),
    )(*operands)
    return h1, c1


# ----------------------------------------------------------------------------
# Deterministic parameter / mask construction (mirrors __init__ / resample_mask)
# ----------------------------------------------------------------------------
def orthogonal_init(key, rows, cols):
    """torch.nn.init.orthogonal_-style semi-orthogonal (rows, cols) matrix."""
    a = jax.random.normal(key, (max(rows, cols), min(rows, cols)), jnp.float32)
    q, r = jnp.linalg.qr(a)
    q = q * jnp.sign(jnp.diagonal(r))                     # sign fix like torch
    if rows < cols:
        q = q.T
    return q[:rows, :cols]


def make_params_and_masks(key, batch, input_size, hidden_size, drop_out_rate):
    K = input_size + hidden_size
    kw = jax.random.split(key, 5)
    # gate order [f, i, o, g]
    weights = jnp.stack(
        [orthogonal_init(kw[i], K, hidden_size) for i in range(4)], axis=0
    )
    masks = jax.random.bernoulli(
        kw[4], p=1.0 - drop_out_rate, shape=(4, batch, K)
    ).astype(jnp.float32)
    return weights, masks


# ----------------------------------------------------------------------------
# Pure-JAX reference (mirrors the PyTorch forward) for verification
# ----------------------------------------------------------------------------
def reference_forward(x, h0, c0, weights, masks, drop_out_rate, training=True,
                      matmul_dtype=jnp.float32):
    comb = jnp.concatenate([h0, x], axis=1).astype(jnp.float32)
    if drop_out_rate > 0.0 and training:
        ins = [comb * masks[i] / (1.0 - drop_out_rate) for i in range(4)]
    else:
        ins = [comb] * 4
    gates = [jnp.dot(ins[i].astype(matmul_dtype),
                     weights[i].astype(matmul_dtype),
                     preferred_element_type=jnp.float32) for i in range(4)]
    f, i, o, g = gates
    c1 = jax.nn.sigmoid(f) * c0 + jax.nn.sigmoid(i) * jnp.tanh(g)
    h1 = jax.nn.sigmoid(o) * jnp.tanh(c1)
    return h1, c1


# ----------------------------------------------------------------------------
if __name__ == "__main__":
    batch = 8
    input_size = 128
    hidden_size = 128          # K = 256, H = 128: lane-dense 128-multiple tiles
    drop_out_rate = 0.5

    key = jax.random.PRNGKey(0)
    k_x, k_h, k_c, k_p = jax.random.split(key, 4)

    x = jax.random.normal(k_x, (batch, input_size), jnp.float32)
    h0 = jax.random.normal(k_h, (batch, hidden_size), jnp.float32)
    c0 = jax.random.normal(k_c, (batch, hidden_size), jnp.float32)

    weights, masks = make_params_and_masks(
        k_p, batch, input_size, hidden_size, drop_out_rate
    )

    # tk=128 -> K=256 splits into 2 reduction steps, exercising the
    # accumulator init/finalize (pl.when) path of the grid.
    h1, c1 = variational_dropout_lstm_cell(
        x, h0, c0, weights, masks, drop_out_rate, training=True, tk=128
    )
    jax.block_until_ready((h1, c1))

    # Tight check vs a reference that also feeds bf16 into the matmul.
    h1_b, c1_b = reference_forward(x, h0, c0, weights, masks, drop_out_rate,
                                   training=True, matmul_dtype=jnp.bfloat16)
    assert jnp.allclose(h1, h1_b, atol=2e-3, rtol=2e-3), "h1 mismatch (bf16 ref)"
    assert jnp.allclose(c1, c1_b, atol=2e-3, rtol=2e-3), "c1 mismatch (bf16 ref)"

    # Loose check vs the exact f32 PyTorch-equivalent forward.
    h1_f, c1_f = reference_forward(x, h0, c0, weights, masks, drop_out_rate,
                                   training=True, matmul_dtype=jnp.float32)
    assert jnp.allclose(h1, h1_f, atol=5e-2, rtol=5e-2), "h1 mismatch (f32 ref)"
    assert jnp.allclose(c1, c1_f, atol=5e-2, rtol=5e-2), "c1 mismatch (f32 ref)"

    # Eval path: no masks materialized or DMA'd at all.
    h1e, c1e = variational_dropout_lstm_cell(
        x, h0, c0, weights, None, drop_out_rate, training=False, tk=128
    )
    jax.block_until_ready((h1e, c1e))
    h1e_b, c1e_b = reference_forward(x, h0, c0, weights, masks, drop_out_rate,
                                     training=False, matmul_dtype=jnp.bfloat16)
    assert jnp.allclose(h1e, h1e_b, atol=2e-3, rtol=2e-3), "h1 mismatch (eval)"
    assert jnp.allclose(c1e, c1e_b, atol=2e-3, rtol=2e-3), "c1 mismatch (eval)"

    print("KERNEL_OK")
</pallas_src>

<mosaic_0001>
module attributes {stable_mosaic.version = 11 : i64} {
  func.func @_vd_lstm_train_kernel(%arg0: i32, %arg1: i32, %arg2: i32, %arg3: memref<8x128xf32, #tpu.memory_space<vmem>>, %arg4: memref<4x8x128xbf16, #tpu.memory_space<vmem>>, %arg5: memref<4x128x128xbf16, #tpu.memory_space<vmem>>, %arg6: memref<8x128xf32, #tpu.memory_space<vmem>>, %arg7: memref<8x128xf32, #tpu.memory_space<vmem>>, %arg8: memref<8x128xf32, #tpu.memory_space<vmem>>, %arg9: memref<8x512xf32, #tpu.memory_space<vmem>>) attributes {dimension_semantics = [#tpu.dimension_semantics<parallel>, #tpu.dimension_semantics<parallel>, #tpu.dimension_semantics<arbitrary>], iteration_bounds = array<i64: 1, 1, 2>, scalar_prefetch = 0 : i64, scratch_operands = 1 : i64, tpu.core_type = #tpu.core_type<tc>, window_params = [{transform_indices = @transform_0, window_bounds = array<i64: 8, 128>}, {transform_indices = @transform_1, window_bounds = array<i64: 4, 8, 128>}, {transform_indices = @transform_2, window_bounds = array<i64: 4, 128, 128>}, {transform_indices = @transform_3, window_bounds = array<i64: 8, 128>}, {transform_indices = @transform_4, window_bounds = array<i64: 8, 128>}, {transform_indices = @transform_5, window_bounds = array<i64: 8, 128>}]} {
    %c0_i32 = arith.constant 0 : i32
    %0 = arith.cmpi eq, %arg2, %c0_i32 : i32
    %1 = arith.extui %0 : i1 to i32
    %c0_i32_0 = arith.constant 0 : i32
    %2 = arith.cmpi ne, %1, %c0_i32_0 : i32
    scf.if %2 {
      %cst_31 = arith.constant 0.000000e+00 : f32
      %43 = vector.broadcast %cst_31 : f32 to vector<8x512xf32>
      %c0_32 = arith.constant 0 : index
      %c0_33 = arith.constant 0 : index
      %44 = vector.load %arg9[%c0_32, %c0_33] : memref<8x512xf32, #tpu.memory_space<vmem>>, vector<8x512xf32>
      tpu.vector_store %arg9[%c0_32, %c0_33], %43 {strides = array<i32>} : memref<8x512xf32, #tpu.memory_space<vmem>>, vector<8x512xf32>,
    } else {
    }
    %c0 = arith.constant 0 : index
    %c0_1 = arith.constant 0 : index
    %3 = vector.load %arg3[%c0, %c0_1] : memref<8x128xf32, #tpu.memory_space<vmem>>, vector<8x128xf32>
    %c0_2 = arith.constant 0 : index
    %c0_3 = arith.constant 0 : index
    %c0_4 = arith.constant 0 : index
    %4 = vector.load %arg4[%c0_2, %c0_3, %c0_4] : memref<4x8x128xbf16, #tpu.memory_space<vmem>>, vector<1x8x128xbf16>
    %5 = vector.shape_cast %4 : vector<1x8x128xbf16> to vector<8x128xbf16>
    %6 = arith.extf %5 : vector<8x128xbf16> to vector<8x128xf32>
    %7 = arith.mulf %3, %6 : vector<8x128xf32>
    %8 = arith.truncf %7 : vector<8x128xf32> to vector<8x128xbf16>
    %c0_5 = arith.constant 0 : index
    %c0_6 = arith.constant 0 : index
    %c0_7 = arith.constant 0 : index
    %9 = vector.load %arg5[%c0_5, %c0_6, %c0_7] : memref<4x128x128xbf16, #tpu.memory_space<vmem>>, vector<1x128x128xbf16>
    %10 = vector.shape_cast %9 : vector<1x128x128xbf16> to vector<128x128xbf16>
    %cst = arith.constant dense<0.000000e+00> : vector<8x128xf32>
    %11 = tpu.matmul %8, %10, %cst {dimension_numbers = #tpu.dot_dimension_numbers<[1], [0], [0], [1], [0, 0, 1, 1], [], []>} : vector<8x128xbf16>, vector<128x128xbf16>, vector<8x128xf32> -> vector<8x128xf32>
    %c1 = arith.constant 1 : index
    %c0_8 = arith.constant 0 : index
    %c0_9 = arith.constant 0 : index
    %12 = vector.load %arg4[%c1, %c0_8, %c0_9] : memref<4x8x128xbf16, #tpu.memory_space<vmem>>, vector<1x8x128xbf16>
    %13 = vector.shape_cast %12 : vector<1x8x128xbf16> to vector<8x128xbf16>
    %14 = arith.extf %13 : vector<8x128xbf16> to vector<8x128xf32>
    %15 = arith.mulf %3, %14 : vector<8x128xf32>
    %16 = arith.truncf %15 : vector<8x128xf32> to vector<8x128xbf16>
    %c1_10 = arith.constant 1 : index
    %c0_11 = arith.constant 0 : index
    %c0_12 = arith.constant 0 : index
    %17 = vector.load %arg5[%c1_10, %c0_11, %c0_12] : memref<4x128x128xbf16, #tpu.memory_space<vmem>>, vector<1x128x128xbf16>
    %18 = vector.shape_cast %17 : vector<1x128x128xbf16> to vector<128x128xbf16>
    %cst_13 = arith.constant dense<0.000000e+00> : vector<8x128xf32>
    %19 = tpu.matmul %16, %18, %cst_13 {dimension_numbers = #tpu.dot_dimension_numbers<[1], [0], [0], [1], [0, 0, 1, 1], [], []>} : vector<8x128xbf16>, vector<128x128xbf16>, vector<8x128xf32> -> vector<8x128xf32>
    %c2 = arith.constant 2 : index
    %c0_14 = arith.constant 0 : index
    %c0_15 = arith.constant 0 : index
    %20 = vector.load %arg4[%c2, %c0_14, %c0_15] : memref<4x8x128xbf16, #tpu.memory_space<vmem>>, vector<1x8x128xbf16>
    %21 = vector.shape_cast %20 : vector<1x8x128xbf16> to vector<8x128xbf16>
    %22 = arith.extf %21 : vector<8x128xbf16> to vector<8x128xf32>
    %23 = arith.mulf %3, %22 : vector<8x128xf32>
    %24 = arith.truncf %23 : vector<8x128xf32> to vector<8x128xbf16>
    %c2_16 = arith.constant 2 : index
    %c0_17 = arith.constant 0 : index
    %c0_18 = arith.constant 0 : index
    %25 = vector.load %arg5[%c2_16, %c0_17, %c0_18] : memref<4x128x128xbf16, #tpu.memory_space<vmem>>, vector<1x128x128xbf16>
    %26 = vector.shape_cast %25 : vector<1x128x128xbf16> to vector<128x128xbf16>
    %cst_19 = arith.constant dense<0.000000e+00> : vector<8x128xf32>
    %27 = tpu.matmul %24, %26, %cst_19 {dimension_numbers = #tpu.dot_dimension_numbers<[1], [0], [0], [1], [0, 0, 1, 1], [], []>} : vector<8x128xbf16>, vector<128x128xbf16>, vector<8x128xf32> -> vector<8x128xf32>
    %c3 = arith.constant 3 : index
    %c0_20 = arith.constant 0 : index
    %c0_21 = arith.constant 0 : index
    %28 = vector.load %arg4[%c3, %c0_20, %c0_21] : memref<4x8x128xbf16, #tpu.memory_space<vmem>>, vector<1x8x128xbf16>
    %29 = vector.shape_cast %28 : vector<1x8x128xbf16> to vector<8x128xbf16>
    %30 = arith.extf %29 : vector<8x128xbf16> to vector<8x128xf32>
    %31 = arith.mulf %3, %30 : vector<8x128xf32>
    %32 = arith.truncf %31 : vector<8x128xf32> to vector<8x128xbf16>
    %c3_22 = arith.constant 3 : index
    %c0_23 = arith.constant 0 : index
    %c0_24 = arith.constant 0 : index
    %33 = vector.load %arg5[%c3_22, %c0_23, %c0_24] : memref<4x128x128xbf16, #tpu.memory_space<vmem>>, vector<1x128x128xbf16>
    %34 = vector.shape_cast %33 : vector<1x128x128xbf16> to vector<128x128xbf16>
    %cst_25 = arith.constant dense<0.000000e+00> : vector<8x128xf32>
    %35 = tpu.matmul %32, %34, %cst_25 {dimension_numbers = #tpu.dot_dimension_numbers<[1], [0], [0], [1], [0, 0, 1, 1], [], []>} : vector<8x128xbf16>, vector<128x128xbf16>, vector<8x128xf32> -> vector<8x128xf32>
    %c0_26 = arith.constant 0 : index
    %c0_27 = arith.constant 0 : index
    %36 = vector.load %arg9[%c0_26, %c0_27] : memref<8x512xf32, #tpu.memory_space<vmem>>, vector<8x512xf32>
    %37 = tpu.concatenate %11, %19, %27, %35 in 1 : vector<8x128xf32>, vector<8x128xf32>, vector<8x128xf32>, vector<8x128xf32> -> vector<8x512xf32>
    %38 = arith.addf %36, %37 : vector<8x512xf32>
    %c0_28 = arith.constant 0 : index
    %c0_29 = arith.constant 0 : index
    %39 = vector.load %arg9[%c0_28, %c0_29] : memref<8x512xf32, #tpu.memory_space<vmem>>, vector<8x512xf32>
    tpu.vector_store %arg9[%c0_28, %c0_29], %38 {strides = array<i32>} : memref<8x512xf32, #tpu.memory_space<vmem>>, vector<8x512xf32>,
    %c1_i32 = arith.constant 1 : i32
    %40 = arith.cmpi eq, %arg2, %c1_i32 : i32
    %41 = arith.extui %40 : i1 to i32
    %c0_i32_30 = arith.constant 0 : i32
    %42 = arith.cmpi ne, %41, %c0_i32_30 : i32
    scf.if %42 {
      %c0_31 = arith.constant 0 : index
      %c0_32 = arith.constant 0 : index
      %43 = vector.load %arg9[%c0_31, %c0_32] : memref<8x512xf32, #tpu.memory_space<vmem>>, vector<8x512xf32>
      %c0_33 = arith.constant 0 : index
      %c0_34 = arith.constant 0 : index
      %44 = vector.load %arg6[%c0_33, %c0_34] : memref<8x128xf32, #tpu.memory_space<vmem>>, vector<8x128xf32>
      %45 = vector.extract_strided_slice %43 {offsets = [0, 0], sizes = [8, 128], strides = [1, 1]} : vector<8x512xf32> to vector<8x128xf32>
      %46 = vector.extract_strided_slice %43 {offsets = [0, 128], sizes = [8, 128], strides = [1, 1]} : vector<8x512xf32> to vector<8x128xf32>
      %47 = vector.extract_strided_slice %43 {offsets = [0, 256], sizes = [8, 128], strides = [1, 1]} : vector<8x512xf32> to vector<8x128xf32>
      %48 = vector.extract_strided_slice %43 {offsets = [0, 384], sizes = [8, 128], strides = [1, 1]} : vector<8x512xf32> to vector<8x128xf32>
      %49 = arith.negf %45 : vector<8x128xf32>
      %50 = math.exp %49 : vector<8x128xf32>
      %cst_35 = arith.constant 1.000000e+00 : f32
      %51 = vector.broadcast %cst_35 : f32 to vector<8x128xf32>
      %52 = arith.addf %51, %50 : vector<8x128xf32>
      %53 = arith.divf %51, %52 : vector<8x128xf32>
      %54 = arith.mulf %53, %44 : vector<8x128xf32>
      %55 = arith.negf %46 : vector<8x128xf32>
      %56 = math.exp %55 : vector<8x128xf32>
      %cst_36 = arith.constant 1.000000e+00 : f32
      %57 = vector.broadcast %cst_36 : f32 to vector<8x128xf32>
      %58 = arith.addf %57, %56 : vector<8x128xf32>
      %59 = arith.divf %57, %58 : vector<8x128xf32>
      %60 = math.tanh %48 : vector<8x128xf32>
      %61 = arith.mulf %59, %60 : vector<8x128xf32>
      %62 = arith.addf %54, %61 : vector<8x128xf32>
      %63 = arith.negf %47 : vector<8x128xf32>
      %64 = math.exp %63 : vector<8x128xf32>
      %cst_37 = arith.constant 1.000000e+00 : f32
      %65 = vector.broadcast %cst_37 : f32 to vector<8x128xf32>
      %66 = arith.addf %65, %64 : vector<8x128xf32>
      %67 = arith.divf %65, %66 : vector<8x128xf32>
      %68 = math.tanh %62 : vector<8x128xf32>
      %69 = arith.mulf %67, %68 : vector<8x128xf32>
      %c0_38 = arith.constant 0 : index
      %c0_39 = arith.constant 0 : index
      %70 = vector.load %arg7[%c0_38, %c0_39] : memref<8x128xf32, #tpu.memory_space<vmem>>, vector<8x128xf32>
      tpu.vector_store %arg7[%c0_38, %c0_39], %69 {strides = array<i32>} : memref<8x128xf32, #tpu.memory_space<vmem>>, vector<8x128xf32>,
      %c0_40 = arith.constant 0 : index
      %c0_41 = arith.constant 0 : index
      %71 = vector.load %arg8[%c0_40, %c0_41] : memref<8x128xf32, #tpu.memory_space<vmem>>, vector<8x128xf32>
      tpu.vector_store %arg8[%c0_40, %c0_41], %62 {strides = array<i32>} : memref<8x128xf32, #tpu.memory_space<vmem>>, vector<8x128xf32>,
    } else {
    }
    return
  }
  func.func @transform_0(%arg0: i32, %arg1: i32, %arg2: i32) -> (i32, i32) {
    %c0_i32 = arith.constant 0 : i32
    return %arg0, %arg2 : i32, i32
  }
  func.func @transform_1(%arg0: i32, %arg1: i32, %arg2: i32) -> (i32, i32, i32) {
    %c0_i32 = arith.constant 0 : i32
    %c0_i32_0 = arith.constant 0 : i32
    return %c0_i32, %arg0, %arg2 : i32, i32, i32
  }
  func.func @transform_2(%arg0: i32, %arg1: i32, %arg2: i32) -> (i32, i32, i32) {
    %c0_i32 = arith.constant 0 : i32
    %c0_i32_0 = arith.constant 0 : i32
    return %c0_i32, %arg2, %arg1 : i32, i32, i32
  }
  func.func @transform_3(%arg0: i32, %arg1: i32, %arg2: i32) -> (i32, i32) {
    %c0_i32 = arith.constant 0 : i32
    return %arg0, %arg1 : i32, i32
  }
  func.func @transform_4(%arg0: i32, %arg1: i32, %arg2: i32) -> (i32, i32) {
    %c0_i32 = arith.constant 0 : i32
    return %arg0, %arg1 : i32, i32
  }
  func.func @transform_5(%arg0: i32, %arg1: i32, %arg2: i32) -> (i32, i32) {
    %c0_i32 = arith.constant 0 : i32
    return %arg0, %arg1 : i32, i32
  }
}

</mosaic_0001>

<bundles_post_ra>
// kernel: tpu_custom_call.1
= control target key start
LH: loop header
LB: loop body
LE: loop exit
PB: predicated region body
PF: predicated region fallthrough
CT: control target
= control target key end

     0   :  { %11 = vsyncpa [#allocation4], 0  ;;  %s1961_s0 = inlined_call_operand.hbm [shape: f32[8,256], index: 0, kind: input, shape index: {}]   ;;  %s1962_s1 = inlined_call_operand.hbm [shape: bf16[4,8,256], index: 1, kind: input, shape index: {}]   ;;  %s1963_s2 = inlined_call_operand.hbm [shape: bf16[4,256,128], index: 2, kind: input, shape index: {}]   ;;  %s1964_s3 = inlined_call_operand.vmem [shape: f32[8,128], index: 3, kind: input, shape index: {}]   ;;  %s1965_s4 = inlined_call_operand.hbm [shape: f32[8,128], index: 4, kind: output, shape index: {0}]   ;;  %s1966_s5 = inlined_call_operand.hbm [shape: f32[8,128], index: 5, kind: output, shape index: {1}]  }
   0x1   :  { %13 = vsyncpa [#allocation4 + $0x1], 0 }
   0x2   :  { %14 = vsyncpa [#allocation7], 0 }
   0x3   :  { %16 = vsyncpa [#allocation7 + $0x1], 0 }
   0x4   :  { %17 = vsyncpa [#allocation5], 0 }
   0x5   :  { %18 = vsyncpa [#allocation11], 0  ;;  %s1647_s18 = smov 0   ;;  %s1649_s19 = smov 0  }
   0x6   :  { %s1651_s20 = smov 0   ;;  %s1653_s21 = smov 0  }
   0x7   :  { %s1655_s22 = smov 0   ;;  %s1657_s23 = smov 0  }
   0x8 LB: > { %s1676_s24 = sadd.s32 4294967295, %s1599_s23   ;;  %s36_s25 = sadd.s32 1, %s1595_s22  ;;  %s1599_s23 = sphi %s1657_s23, %s24_s23   ;;  %s1595_s22 = sphi %s1655_s22, %s1975_s22   ;;  %s1591_s21 = sphi %s1653_s21, %s1974_s21   ;;  %s1587_s20 = sphi %s1651_s20, %s1973_s20   ;;  %s1583_s19 = sphi %s1649_s19, %s1972_s19   ;;  %s1579_s18 = sphi %s1647_s18, %s1971_s18  }
   0x9   : > { %p37_p0 = scmp.ge.s32.totalorder %s36_s25, 2  ;;  %s52_s26 = sadd.s32 1, %s1587_s20 }
   0xa   : > { %p59_p1 = scmp.ne.s32.totalorder %s1587_s20, %s1583_s19  ;;  %p60_p2 = scmp.eq.s32.totalorder %s1599_s23, 0 }
   0xb   : > { %s1977_s25 = smov (%p37_p0, %s36_s25), 0  ;;  %p65_p4 = scmp.ne.s32.totalorder %s1583_s19, %s1579_s18 }
   0xc   : > { %p1685_p3 = por %p60_p2, %p59_p1  ;;  %s48_s28 = ssub.s32 %s1595_s22, %s1977_s25 }
   0xd   : > { %p66_p5 = scmp.eq.s32.totalorder %s1676_s24, 0  ;;  %p50_p6 = scmp.eq.s32.totalorder %s48_s28, 0 }
   0xe   : > { %p1069_p8 = scmp.ge.s32.totalorder %s1599_s23, 2 }
   0xf   : > { %p1693_p7 = por %p66_p5, %p65_p4  ;;  %s1702_s6 = sand.u32 (!%p1069_p8), 1, %s1587_s20  }
  0x10   : > { %s1698_s30 = scalar_select %p50_p6, %s1587_s20, %s52_s26  }
  0x11   : > { %s1969_s29 = scalar_select %p1693_p7, 1, 0 }
  0x12   : > { %235 = sbr.rel (%p1069_p8) target bundleno = 84 (0x54), region = 20  ;;  %s1071_s7 = sshll.u32 (!%p1069_p8), %s1595_s22, 7 }
  0x13   : > { %s1070_s8 = sshll.u32 (!%p1069_p8), %s1702_s6, 3  ;;  %s1709_s11 = scalar_lea.hbm (!%p1069_p8), %s1961_s0, %s1071_s7 }
  0x14   : > { %s243_s12 = scalar_lea.vmem (!%p1069_p8), [#allocation3], %s1070_s8  ;;  %s1072_s14 = sshll.u32 (!%p1069_p8), %s1702_s6, 4 }
  0x15   : > { %s252_s13 = sshll.u32 (!%p1069_p8), %s243_s12, 4  ;;  %s240_s15 = scalar_lea.sflag (!%p1069_p8), [#allocation4], %s1702_s6  ;;  %s253_s13 = int_to_ptr.vmem [resolvable:$true] %s252_s13 }
  0x16   : > { %s1429_s16 = scalar_lea.hbm (!%p1069_p8), %s1709_s11, 128  ;;  %s1433_s26 = scalar_lea.hbm (!%p1069_p8), %s1961_s0, 256 }
  0x17   : > { %p1430_p9 = scmp.ne.s32.totalorder (!%p1069_p8), %s1709_s11, %s1429_s16  ;;  %p1434_p12 = scmp.lt.u32.totalorder (!%p1069_p8), %s1709_s11, %s1961_s0 }
  0x18   : > { %p1435_p13 = scmp.lt.u32.totalorder (!%p1069_p8), %s1433_s26, %s1429_s16  ;;  %p1437_p1 = scmp.lt.u32.totalorder (!%p1069_p8), %s1429_s16, %s1709_s11 }
  0x19   : > { %p1431_p10 = pnand %p1430_p9, %p1685_p3 }
  0x1a   : > { %p1436_p0 = por %p1435_p13, %p1434_p12 }
  0x1b   : > { %p1432_p11 = pneg %p1431_p10 }
  0x1c   : > { %p1438_p2 = por %p1437_p1, %p1436_p0 }
  0x1e   : > { %p1439_p4 = pnand %p1438_p2, %p1432_p11 }
  0x20   : > { %1442 = shalt.err (!%p1439_p4)
}
  0x21   : > { %s1443_s8 = scalar_lea.vmem %s253_s13, 128  ;;  %s1601_s9 = smov [#allocation3]  }
  0x22   : > { %p1444_p5 = scmp.ne.s32.totalorder %s253_s13, %s1443_s8  ;;  %s1447_s10 = sshll.u32 %s1601_s9, 4  ;;  %s1448_s10 = int_to_ptr.vmem [resolvable:$false] %s1447_s10 }
  0x23   : > { %s1449_s12 = scalar_lea.vmem %s1448_s10, 256  ;;  %p1450_p9 = scmp.lt.s32.totalorder %s253_s13, %s1448_s10 }
  0x24   : > { %p1445_p6 = pnand %p1444_p5, %p1685_p3  ;;  %p1451_p10 = scmp.lt.s32.totalorder %s1449_s12, %s1443_s8 }
  0x26   : > { %p1446_p8 = pneg %p1445_p6  ;;  %p1452_p7 = por %p1451_p10, %p1450_p9 }
  0x28   : > { %p1453_p12 = pnand %p1452_p7, %p1446_p8 }
  0x2a   : > { %1456 = shalt.err (!%p1453_p12)
}
  0x2b   : > { %1294 = dma.hbm_to_vmem [thread:$0]  (%p1685_p3), %s1709_s11, 128, %s253_s13, %s240_s15  }
  0x2c   : > { %s263_s16 = scalar_lea.vmem [#allocation6], %s1072_s14  ;;  %s259_s18 = sand.u32 1, %s1599_s23  }
  0x2d   : > { %s271_s17 = sshll.u32 %s263_s16, 4  ;;  %s1073_s26 = sshll.u32 %s1595_s22, 6  ;;  %s1733_s17 = int_to_ptr.vmem [resolvable:$true] %s271_s17 }
  0x2e   : > { %s1739_s8 = scalar_lea.hbm %s1962_s1, %s1073_s26  ;;  %s1741_s9 = scalar_lea.sflag [#allocation7], %s259_s18 }
  0x2f   : > { %s1457_s10 = scalar_lea.hbm %s1739_s8, 256  ;;  %s1461_s14 = scalar_lea.hbm %s1962_s1, 512 }
  0x30   : > { %p1458_p7 = scmp.ne.s32.totalorder %s1739_s8, %s1457_s10  ;;  %p1462_p0 = scmp.lt.u32.totalorder %s1739_s8, %s1962_s1 }
  0x31   : > { %p1463_p1 = scmp.lt.u32.totalorder %s1461_s14, %s1457_s10  ;;  %p1465_p4 = scmp.lt.u32.totalorder %s1457_s10, %s1739_s8 }
  0x32   : > { %p1459_p11 = pnand %p1458_p7, %p1685_p3 }
  0x33   : > { %p1464_p2 = por %p1463_p1, %p1462_p0 }
  0x34   : > { %p1460_p13 = pneg %p1459_p11 }
  0x35   : > { %p1466_p5 = por %p1465_p4, %p1464_p2 }
  0x37   : > { %p1467_p6 = pnand %p1466_p5, %p1460_p13 }
  0x39   : > { %1470 = shalt.err (!%p1467_p6)
}
  0x3a   : > { %s1471_s16 = scalar_lea.vmem %s1733_s17, 256  ;;  %s1602_s18 = smov [#allocation6]  }
  0x3b   : > { %p1472_p8 = scmp.ne.s32.totalorder %s1733_s17, %s1471_s16  ;;  %s1475_s26 = sshll.u32 %s1602_s18, 4  ;;  %s1476_s26 = int_to_ptr.vmem [resolvable:$false] %s1475_s26 }
  0x3c   : > { %s1477_s28 = scalar_lea.vmem %s1476_s26, 512  ;;  %p1478_p12 = scmp.lt.s32.totalorder %s1733_s17, %s1476_s26 }
  0x3d   : > { %p1473_p9 = pnand %p1472_p8, %p1685_p3  ;;  %p1479_p7 = scmp.lt.s32.totalorder %s1477_s28, %s1471_s16 }
  0x3f   : > { %p1474_p10 = pneg %p1473_p9  ;;  %p1480_p11 = por %p1479_p7, %p1478_p12 }
  0x41   : > { %p1481_p0 = pnand %p1480_p11, %p1474_p10 }
  0x43   : > { %1484 = shalt.err (!%p1481_p0)
}
  0x44   : > { %s1603_s7 = smov 128   ;;  %s1604_s10 = smov 64  }
  0x45   : > { %s1605_s11 = smov 4  }
  0x46   : > { %1295 = dma.hbm_to_vmem [thread:$0]  (%p1685_p3), %s1739_s8, 256, %s1733_s17, %s1741_s9, %s1603_s7, %s1604_s10, %s1605_s11  }
  0x47   : > { %s1074_s13 = sshll.u32 %s1702_s6, 8  ;;  %s1177_s14 = sshll.u32 %s1595_s22, 10 }
  0x48   : > { %s292_s16 = scalar_lea.hbm %s1963_s2, %s1177_s14  ;;  %s285_s26 = scalar_lea.vmem [#allocation8], %s1074_s13 }
  0x49   : > { %s1296_s18 = scalar_select %p1685_p3, [#allocation0], [#allocation14] }
  0x4a   : > { %s305_s28 = sshll.u32 %s285_s26, 4  ;;  %s1606_s8 = smov 2048   ;;  %s306_s28 = int_to_ptr.vmem [resolvable:$true] %s305_s28 }
  0x4b   : > { %s297_s17 = sld [smem:[%s1296_s18]]   ;;  %s1607_s7 = smov 1024  }
  0x4c   : > { %1297 = sst [smem:[#allocation13]] (%p1685_p3), %s1606_s8  ;;  %s1608_s6 = smov 16  }
  0x4d   : > { %1298 = sst [smem:[#allocation13 + $0x1]] (%p1685_p3), %s1607_s7  ;;  %s1609_s10 = smov 64  }
  0x4e   : > { %1299 = sst [smem:[#allocation13 + $0x2]] (%p1685_p3), %s1608_s6  ;;  %s1610_s13 = smov 4  }
  0x4f   : > { %1300 = sst [smem:[#allocation13 + $0x3]] (%p1685_p3), %s1609_s10  ;;  %s1611_s15 = smov [#allocation12]  }
  0x50   : > { %1301 = sst [smem:[#allocation13 + $0x4]] (%p1685_p3), %s1609_s10 }
  0x51   : > { %s1077_s11 = sshll.u32 %s297_s17, 26  ;;  %1302 = sst [smem:[#allocation13 + $0x5]] (%p1685_p3), %s1610_s13 }
  0x52   : > { %s1078_s14 = sadd.s32 134217728, %s1077_s11 }
  0x53   : > { %1303 = dma.general (%p1685_p3), %s292_s16, 4096, %s306_s28, %s1741_s9, %s1611_s15, [#allocation13], %s1078_s14, 0  }
  0x54 PF: > { %p1079_p13 = scmp.ge.s32.totalorder %s1599_s23, 1  ;;  %p326_p1 = scmp.lt.s32.totalorder %s1599_s23, 3 }
  0x56   : > { %p327_p2 = pnand %p1079_p13, %p326_p1 }
  0x57   : > { %s332_s12 = sand.u32 (!%p327_p2), 1, %s1583_s19   ;;  %p1970_p4 = scmp.ne.s32.totalorder (!%p327_p2), %s1969_s29, 0 }
  0x58   : > { %330 = sbr.rel (%p327_p2) target bundleno = 477 (0x1dd), region = 36  ;;  %s1080_s18 = sshll.u32 (!%p327_p2), %s332_s12, 3 }
  0x59   : > { %s333_s26 = scalar_lea.sflag (!%p327_p2), [#allocation4], %s332_s12  ;;  %s1790_s17 = scalar_lea.vmem (!%p327_p2), [#allocation3], %s1080_s18 }
  0x5f   : > { %1562 = dma.done.wait (%p1970_p4), %s333_s26, 128  }
  0x60   : > { %1564 = vsyncadd (%p1970_p4), %s333_s26, 4294967168  ;;  %s341_s27 = sand.u32 1, %s1676_s24   ;;  %s1081_s9 = sshll.u32 %s332_s12, 4 }
  0x61   : > { %s342_s16 = scalar_lea.sflag [#allocation7], %s341_s27  ;;  %s1797_s28 = scalar_lea.vmem [#allocation6], %s1081_s9 }
  0x62   : > { %1566 = dma.done.wait (%p1970_p4), %s342_s16, 4352  }
  0x63   : > { %1568 = vsyncadd (%p1970_p4), %s342_s16, 4294962944  ;;  %s1082_s8 = sshll.u32 %s332_s12, 8  ;;  %p1083_p3 = scmp.ne.s32.totalorder %s1591_s21, 0 }
  0x64   : > { %s1803_s7 = scalar_lea.vmem [#allocation8], %s1082_s8  ;;  %v1612_v0 = vmov (!%p1083_p3), 0.0  }
  0x65   : > { %405 = sbr.rel (%p1083_p3) target bundleno = 108 (0x6c), region = 52  ;;  %406 = vst [vmem:[#allocation2] sm:$0xff] (!%p1083_p3), %v1612_v0  ;;  %407 = vst [vmem:[#allocation2 + $0x8] sm:$0xff] (!%p1083_p3), %v1612_v0 }
  0x66   : > { %408 = vst [vmem:[#allocation2 + $0x10] sm:$0xff] (!%p1083_p3), %v1612_v0  ;;  %409 = vst [vmem:[#allocation2 + $0x18] sm:$0xff] (!%p1083_p3), %v1612_v0 }
  0x6c PF: > { %v1381_v1 = vld [vmem:[%s1803_s7] sm:$0xff]   ;;  %v1613_v2 = vmov 0.0   ;;  %v1383_v4 = vld [vmem:[%s1803_s7 + $0x8] sm:$0xff]   ;;  %vm1614_vm0 = vmmov 0   ;;  %v1385_v6 = vld [vmem:[%s1803_s7 + $0x10] sm:$0xff]   ;;  %p1167_p5 = scmp.ne.s32.totalorder %s1591_s21, 1 }
  0x6d   : > { %1214 = vmatprep.subr.bf16.mxu0 %v1613_v2  ;;  %1234 = vmatprep.subr.bf16.mxu1 %v1613_v2  ;;  %v1382_v3 = vld [vmem:[%s1803_s7 + $0x40] sm:$0xff]   ;;  %v1384_v5 = vld [vmem:[%s1803_s7 + $0x48] sm:$0xff]   ;;  %v1386_v7 = vld [vmem:[%s1803_s7 + $0x50] sm:$0xff]  }
  0x6e   : > { %1215 = vmatpush3.bf16.msra.mxu0 %v1381_v1  ;;  %1230 = vmatprep.mubr.msk.bf16.mxu0 %vm1614_vm0, %v1613_v2  ;;  %v1387_v8 = vld [vmem:[%s1803_s7 + $0x18] sm:$0xff]   ;;  %v1389_v10 = vld [vmem:[%s1803_s7 + $0x20] sm:$0xff]   ;;  %v1391_v12 = vld [vmem:[%s1803_s7 + $0x28] sm:$0xff]  }
  0x6f   : > { %1235 = vmatpush3.bf16.msra.mxu1 %v1382_v3  ;;  %1216 = vmatprep.subr.bf16.mxu0 %v1613_v2  ;;  %v1388_v9 = vld [vmem:[%s1803_s7 + $0x58] sm:$0xff]   ;;  %v1390_v11 = vld [vmem:[%s1803_s7 + $0x60] sm:$0xff]   ;;  %v1392_v14 = vld [vmem:[%s1803_s7 + $0x68] sm:$0xff]  }
  0x70   : > { %1236 = vmatprep.subr.bf16.mxu1 %v1613_v2  ;;  %1250 = vmatprep.mubr.msk.bf16.mxu1 %vm1614_vm0, %v1613_v2  ;;  %v411_v13 = vld [vmem:[%s1797_s28] sm:$0xff]   ;;  %v1837_v17 = vld [vmem:[%s1790_s17] sm:$0xff]  ;;  %v1399_v28 = vld [vmem:[%s1803_s7 + $0x88] sm:$0xff]  }
  0x71   : > { %v1393_v15 = vld [vmem:[%s1803_s7 + $0x30] sm:$0xff]   ;;  %v412_v16 = vunpack.c.l.bf16 %v411_v13  ;;  %v521_v18 = vunpack.c.h.bf16 %v411_v13  ;;  %v1395_v21 = vld [vmem:[%s1803_s7 + $0x38] sm:$0xff]   ;;  %v1397_v26 = vld [vmem:[%s1803_s7 + $0x80] sm:$0xff]  }
  0x72   : > { %1217 = vmatpush3.bf16.msra.mxu0 %v1383_v4  ;;  %v1394_v19 = vld [vmem:[%s1803_s7 + $0x70] sm:$0xff]   ;;  %v1396_v23 = vld [vmem:[%s1803_s7 + $0x78] sm:$0xff]   ;;  %v1398_v27 = vld [vmem:[%s1803_s7 + $0xc0] sm:$0xff]  }
  0x73   : > { %1237 = vmatpush3.bf16.msra.mxu1 %v1384_v5  ;;  %1218 = vmatprep.subr.bf16.mxu0 %v1613_v2  ;;  %v413_v20 = vmul.f32 %v412_v16, %v1837_v17  ;;  %v522_v22 = vmul.f32 %v521_v18, %v1837_v17  ;;  %v1400_v29 = vld [vmem:[%s1803_s7 + $0xc8] sm:$0xff]   ;;  %v1401_v30 = vld [vmem:[%s1803_s7 + $0x90] sm:$0xff]   ;;  %v1403_v32 = vld [vmem:[%s1803_s7 + $0x98] sm:$0xff]  }
  0x74   : > { %1238 = vmatprep.subr.bf16.mxu1 %v1613_v2  ;;  %v1402_v31 = vld [vmem:[%s1803_s7 + $0xd0] sm:$0xff]   ;;  %v1404_v33 = vld [vmem:[%s1803_s7 + $0xd8] sm:$0xff]   ;;  %v1405_v34 = vld [vmem:[%s1803_s7 + $0xa0] sm:$0xff]  }
  0x75   : > { %v414_v24 = vpack.c.bf16 %v413_v20, %v413_v20  ;;  %v523_v25 = vpack.c.bf16 %v522_v22, %v522_v22  ;;  %v1406_v35 = vld [vmem:[%s1803_s7 + $0xe0] sm:$0xff]   ;;  %v1407_v36 = vld [vmem:[%s1803_s7 + $0xa8] sm:$0xff]   ;;  %v1409_v40 = vld [vmem:[%s1803_s7 + $0xb0] sm:$0xff]  }
  0x76   : > { %1219 = vmatpush3.bf16.msra.mxu0 %v1385_v6  ;;  %v1117_v37 = vld [vmem:[%s1797_s28 + $0x8] sm:$0xff]   ;;  %v1410_v42 = vld [vmem:[%s1803_s7 + $0xf0] sm:$0xff]   ;;  %v851_v61 = vld [vmem:[#allocation2 + $0x10] sm:$0xff] }
  0x77   : > { %1239 = vmatpush3.bf16.msra.mxu1 %v1386_v7  ;;  %1220 = vmatprep.subr.bf16.mxu0 %v1613_v2  ;;  %v1408_v38 = vld [vmem:[%s1803_s7 + $0xe8] sm:$0xff]   ;;  %v631_v39 = vunpack.c.l.bf16 %v1117_v37  ;;  %v741_v41 = vunpack.c.h.bf16 %v1117_v37  ;;  %v1411_v44 = vld [vmem:[%s1803_s7 + $0xb8] sm:$0xff]   ;;  %v849_v49 = vld [vmem:[#allocation2] sm:$0xff] }
  0x78   : > { %1240 = vmatprep.subr.bf16.mxu1 %v1613_v2  ;;  %v1412_v46 = vld [vmem:[%s1803_s7 + $0xf8] sm:$0xff]   ;;  %v852_v62 = vld [vmem:[#allocation2 + $0x18] sm:$0xff] }
  0x79   : > { %v632_v43 = vmul.f32 %v631_v39, %v1837_v17  ;;  %v742_v45 = vmul.f32 %v741_v41, %v1837_v17  ;;  %v850_v50 = vld [vmem:[#allocation2 + $0x8] sm:$0xff] }
  0x7a   : > { %1221 = vmatpush3.bf16.msra.mxu0 %v1387_v8 }
  0x7b   : > { %1241 = vmatpush3.bf16.msra.mxu1 %v1388_v9  ;;  %1222 = vmatprep.subr.bf16.mxu0 %v1613_v2  ;;  %v633_v47 = vpack.c.bf16 %v632_v43, %v632_v43  ;;  %v743_v48 = vpack.c.bf16 %v742_v45, %v742_v45 }
  0x7c   : > { %1242 = vmatprep.subr.bf16.mxu1 %v1613_v2 }
  0x7e   : > { %1223 = vmatpush3.bf16.msra.mxu0 %v1389_v10 }
  0x7f   : > { %1243 = vmatpush3.bf16.msra.mxu1 %v1390_v11  ;;  %1224 = vmatprep.subr.bf16.mxu0 %v1613_v2 }
  0x80   : > { %1244 = vmatprep.subr.bf16.mxu1 %v1613_v2 }
  0x82   : > { %1225 = vmatpush3.bf16.msra.mxu0 %v1391_v12 }
  0x83   : > { %1245 = vmatpush3.bf16.msra.mxu1 %v1392_v14  ;;  %1226 = vmatprep.subr.bf16.mxu0 %v1613_v2 }
  0x84   : > { %1246 = vmatprep.subr.bf16.mxu1 %v1613_v2 }
  0x86   : > { %1227 = vmatpush3.bf16.msra.mxu0 %v1393_v15 }
  0x87   : > { %1247 = vmatpush3.bf16.msra.mxu1 %v1394_v19  ;;  %1228 = vmatprep.subr.bf16.mxu0 %v1613_v2 }
  0x88   : > { %1248 = vmatprep.subr.bf16.mxu1 %v1613_v2 }
  0x8a   : > { %1229 = vmatpush3.bf16.msra.mxu0 %v1395_v21  ;;  %v869_v21 = vld [vmem:[%s1964_s3] sm:$0xff] (!%p1167_p5) }
  0x8b   : > { %1249 = vmatpush3.bf16.msra.mxu1 %v1396_v23  ;;  %1254 = vmatprep.subr.bf16.mxu0 %v1613_v2 }
  0x8c   : > { %1274 = vmatprep.subr.bf16.mxu1 %v1613_v2 }
  0x8d   : > { %1231 = vmatmul.mubr.bf16.vlgmr.msra.gmra.mrb[0].mxu0 %v414_v24 }
  0x8e   : > { %1251 = vmatmul.mubr.bf16.vlgmr.msra.gmra.mrb[0].mxu1 %v523_v25  ;;  %1255 = vmatpush3.bf16.msra.mxu0 %v1397_v26 }
  0x8f   : > { %1275 = vmatpush3.bf16.msra.mxu1 %v1398_v27  ;;  %1256 = vmatprep.subr.bf16.mxu0 %v1613_v2 }
  0x90   : > { %1276 = vmatprep.subr.bf16.mxu1 %v1613_v2  ;;  %1270 = vmatprep.mubr.msk.bf16.mxu0 %vm1614_vm0, %v1613_v2 }
  0x91   : > { %1290 = vmatprep.mubr.msk.bf16.mxu1 %vm1614_vm0, %v1613_v2 }
  0x92   : > { %1257 = vmatpush3.bf16.msra.mxu0 %v1399_v28 }
  0x93   : > { %1277 = vmatpush3.bf16.msra.mxu1 %v1400_v29  ;;  %1258 = vmatprep.subr.bf16.mxu0 %v1613_v2 }
  0x94   : > { %1278 = vmatprep.subr.bf16.mxu1 %v1613_v2 }
  0x96   : > { %1259 = vmatpush3.bf16.msra.mxu0 %v1401_v30 }
  0x97   : > { %1279 = vmatpush3.bf16.msra.mxu1 %v1402_v31  ;;  %1260 = vmatprep.subr.bf16.mxu0 %v1613_v2 }
  0x98   : > { %1280 = vmatprep.subr.bf16.mxu1 %v1613_v2 }
  0x9a   : > { %1261 = vmatpush3.bf16.msra.mxu0 %v1403_v32 }
  0x9b   : > { %1281 = vmatpush3.bf16.msra.mxu1 %v1404_v33  ;;  %1262 = vmatprep.subr.bf16.mxu0 %v1613_v2 }
  0x9c   : > { %1282 = vmatprep.subr.bf16.mxu1 %v1613_v2 }
  0x9e   : > { %1263 = vmatpush3.bf16.msra.mxu0 %v1405_v34 }
  0x9f   : > { %1283 = vmatpush3.bf16.msra.mxu1 %v1406_v35  ;;  %1264 = vmatprep.subr.bf16.mxu0 %v1613_v2 }
  0xa0   : > { %1284 = vmatprep.subr.bf16.mxu1 %v1613_v2 }
  0xa2   : > { %1265 = vmatpush3.bf16.msra.mxu0 %v1407_v36 }
  0xa3   : > { %1285 = vmatpush3.bf16.msra.mxu1 %v1408_v38  ;;  %1266 = vmatprep.subr.bf16.mxu0 %v1613_v2 }
  0xa4   : > { %1286 = vmatprep.subr.bf16.mxu1 %v1613_v2 }
  0xa6   : > { %1267 = vmatpush3.bf16.msra.mxu0 %v1409_v40 }
  0xa7   : > { %1287 = vmatpush3.bf16.msra.mxu1 %v1410_v42  ;;  %1268 = vmatprep.subr.bf16.mxu0 %v1613_v2 }
  0xa8   : > { %1288 = vmatprep.subr.bf16.mxu1 %v1613_v2 }
  0xaa   : > { %1269 = vmatpush3.bf16.msra.mxu0 %v1411_v44 }
  0xab   : > { %1289 = vmatpush3.bf16.msra.mxu1 %v1412_v46 }
  0xad   : > { %1271 = vmatmul.mubr.bf16.vlgmr.msra.gmra.mrb[4].mxu0 %v633_v47 }
  0xae   : > { %1291 = vmatmul.mubr.bf16.vlgmr.msra.gmra.mrb[4].mxu1 %v743_v48 }
 0x160   : > { %v513_v51 = vpop.f32.mrb[0].mxu0 }
 0x161   : > { %v853_v52 = vadd.f32 %v849_v49, %v513_v51  ;;  %v623_v53 = vpop.f32.mrb[0].mxu1  ;;  %v1232_v54 = vpop.f32.mrb[1].mxu0 }
 0x162   : > { %v854_v55 = vadd.f32 %v850_v50, %v623_v53  ;;  %v1252_v56 = vpop.f32.mrb[1].mxu1  ;;  %v516_v57 = vpop.f32.mrb[2].mxu0 }
 0x163   : > { %857 = vst [vmem:[#allocation2] sm:$0xff] %v853_v52  ;;  %v626_v58 = vpop.f32.mrb[2].mxu1  ;;  %v1233_v59 = vpop.f32.mrb[3].mxu0 }
 0x164   : > { %858 = vst [vmem:[#allocation2 + $0x8] sm:$0xff] %v854_v55  ;;  %v1253_v60 = vpop.f32.mrb[3].mxu1 }
 0x16a   : > { %v865_v9 = vld [vmem:[#allocation2] sm:$0xff] (!%p1167_p5) }
 0x16b   : > { %v866_v10 = vld [vmem:[#allocation2 + $0x8] sm:$0xff] (!%p1167_p5)  ;;  %v1168_v11 = vmul.f32 (!%p1167_p5), -1.442695, %v865_v9 }
 0x16c   : > { %v1169_v12 = vmul.f32 (!%p1167_p5), -1.442695, %v866_v10 }
 0x16d   : > { %1413 = vpow2.f32 (!%p1167_p5), %v1168_v11 }
 0x16e   : > { %1415 = vpow2.f32 (!%p1167_p5), %v1169_v12 }
 0x177   : > { %v1414_v16 = vpop.eup (!%p1167_p5), %1413 }
 0x178   : > { %v1416_v17 = vpop.eup (!%p1167_p5), %1415  ;;  %v873_v18 = vadd.f32 (!%p1167_p5), 1.0, %v1414_v16 }
 0x179   : > { %v880_v19 = vadd.f32 (!%p1167_p5), 1.0, %v1416_v17 }
 0x17e   : > { %864 = sbr.rel (%p1167_p5) target bundleno = 429 (0x1ad), region = 56 }
 0x180   : > { %v733_v63 = vpop.f32.mrb[4].mxu0 }
 0x181   : > { %v855_v0 = vadd.f32 %v851_v61, %v733_v63  ;;  %v843_v1 = vpop.f32.mrb[4].mxu1  ;;  %v1272_v2 = vpop.f32.mrb[5].mxu0 }
 0x182   : > { %v856_v3 = vadd.f32 %v852_v62, %v843_v1  ;;  %v1292_v4 = vpop.f32.mrb[5].mxu1  ;;  %v736_v5 = vpop.f32.mrb[6].mxu0 }
 0x183   : > { %859 = vst [vmem:[#allocation2 + $0x10] sm:$0xff] %v855_v0  ;;  %v846_v6 = vpop.f32.mrb[6].mxu1  ;;  %v1273_v7 = vpop.f32.mrb[7].mxu0 }
 0x184   : > { %860 = vst [vmem:[#allocation2 + $0x18] sm:$0xff] %v856_v3  ;;  %v1293_v8 = vpop.f32.mrb[7].mxu1 }
 0x18a   : > { %v867_v13 = vld [vmem:[#allocation2 + $0x10] sm:$0xff] }
 0x18b   : > { %v1170_v14 = vmul.f32 -1.442695, %v867_v13  ;;  %v868_v15 = vld [vmem:[#allocation2 + $0x18] sm:$0xff] }
 0x18d   : > { %1417 = vpow2.f32 %v1170_v14 }
 0x18e   : > { %1419 = vtanh.f32 %v868_v15 }
 0x18f   : > { %1421 = vrcp.f32 %v873_v18 }
 0x190   : > { %1423 = vrcp.f32 %v880_v19 }
 0x197   : > { %v1418_v20 = vpop.eup %1417 }
 0x198   : > { %v1420_v22 = vpop.eup %1419  ;;  %v889_v24 = vadd.f32 1.0, %v1418_v20 }
 0x199   : > { %v1422_v23 = vpop.eup %1421 }
 0x19a   : > { %v1424_v25 = vpop.eup %1423  ;;  %v876_v26 = vmul.f32 %v1422_v23, %v869_v21  ;;  %1425 = vrcp.f32 %v889_v24 }
 0x19b   : > { %v884_v27 = vmul.f32 %v1424_v25, %v1420_v22 }
 0x19d   : > { %v885_v28 = vadd.f32 %v884_v27, %v876_v26 }
 0x19f   : > { %1427 = vtanh.f32 %v885_v28  ;;  %895 = vst [vmem:[#allocation10] sm:$0xff] %v885_v28 }
 0x1a4   : > { %v1426_v29 = vpop.eup %1425 }
 0x1a9   : > { %v1428_v30 = vpop.eup %1427 }
 0x1aa   : > { %v893_v31 = vmul.f32 %v1428_v30, %v1426_v29 }
 0x1ac   : > { %894 = vst [vmem:[#allocation9] sm:$0xff] %v893_v31 }
 0x1ad PF: > { %p1315_p6 = scmp.eq.s32.totalorder %s1676_s24, 1  ;;  %s1615_s6 = smov [#allocation9]  }
 0x1ae   : > { %s906_s10 = sshll.u32 %s1615_s6, 4  ;;  %s1616_s11 = smov [#allocation10]   ;;  %s907_s10 = int_to_ptr.vmem [resolvable:$true] %s906_s10 }
 0x1af   : > { %s920_s13 = sshll.u32 %s1616_s11, 4  ;;  %s1485_s14 = scalar_lea.vmem %s907_s10, 128  ;;  %s1892_s13 = int_to_ptr.vmem [resolvable:$true] %s920_s13 }
 0x1b0   : > { %p1486_p8 = scmp.ne.s32.totalorder %s907_s10, %s1485_s14  ;;  %p1492_p12 = scmp.lt.s32.totalorder %s907_s10, %s907_s10 }
 0x1b1   : > { %p1493_p7 = scmp.lt.s32.totalorder %s1485_s14, %s1485_s14 }
 0x1b2   : > { %p1487_p9 = pnand %p1486_p8, %p1315_p6 }
 0x1b3   : > { %p1494_p11 = por %p1493_p7, %p1492_p12 }
 0x1b4   : > { %p1488_p10 = pneg %p1487_p9 }
 0x1b6   : > { %p1495_p0 = pnand %p1494_p11, %p1488_p10 }
 0x1b8   : > { %1498 = shalt.err (!%p1495_p0)
}
 0x1b9   : > { %s1499_s18 = scalar_lea.hbm %s1965_s4, 128 }
 0x1ba   : > { %p1500_p13 = scmp.ne.s32.totalorder %s1965_s4, %s1499_s18  ;;  %p1505_p4 = scmp.lt.u32.totalorder %s1499_s18, %s1965_s4 }
 0x1bc   : > { %p1501_p1 = pnand %p1500_p13, %p1315_p6 }
 0x1be   : > { %p1502_p2 = pneg %p1501_p1 }
 0x1c0   : > { %p1507_p3 = pnand %p1505_p4, %p1502_p2 }
 0x1c2   : > { %1510 = shalt.err (!%p1507_p3)
}
 0x1c3   : > { %1308 = dma.vmem_to_hbm [thread:$0]  (%p1315_p6), %s907_s10, 128, %s1965_s4, [#allocation5]  }
 0x1c4   : > { %s1511_s8 = scalar_lea.vmem %s1892_s13, 128  ;;  %p1518_p10 = scmp.lt.s32.totalorder %s1892_s13, %s1892_s13 }
 0x1c5   : > { %p1512_p5 = scmp.ne.s32.totalorder %s1892_s13, %s1511_s8  ;;  %p1519_p12 = scmp.lt.s32.totalorder %s1511_s8, %s1511_s8 }
 0x1c7   : > { %p1513_p8 = pnand %p1512_p5, %p1315_p6  ;;  %p1520_p7 = por %p1519_p12, %p1518_p10 }
 0x1c9   : > { %p1514_p9 = pneg %p1513_p8 }
 0x1cb   : > { %p1521_p11 = pnand %p1520_p7, %p1514_p9 }
 0x1cd   : > { %1524 = shalt.err (!%p1521_p11)
}
 0x1ce   : > { %s1525_s29 = scalar_lea.hbm %s1966_s5, 128 }
 0x1cf   : > { %p1526_p0 = scmp.ne.s32.totalorder %s1966_s5, %s1525_s29  ;;  %p1531_p2 = scmp.lt.u32.totalorder %s1525_s29, %s1966_s5 }
 0x1d1   : > { %p1527_p13 = pnand %p1526_p0, %p1315_p6 }
 0x1d3   : > { %p1528_p1 = pneg %p1527_p13 }
 0x1d5   : > { %p1533_p4 = pnand %p1531_p2, %p1528_p1 }
 0x1d7   : > { %1536 = shalt.err (!%p1533_p4)
}
 0x1d8   : > { %1310 = dma.vmem_to_hbm [thread:$0]  (%p1315_p6), %s1892_s13, 128, %s1966_s5, [#allocation11]  }
 0x1d9   : > { %1570 = dma.done.wait (%p1315_p6), [#allocation5], 128  }
 0x1da   : > { %1572 = vsyncadd (%p1315_p6), [#allocation5], 4294967168 }
 0x1db   : > { %1574 = dma.done.wait (%p1315_p6), [#allocation11], 128  }
 0x1dc   : > { %1576 = vsyncadd (%p1315_p6), [#allocation11], 4294967168 }
 0x1dd PF: > { %s24_s23 = sadd.s32 1, %s1599_s23   ;;  %s1971_s18 = smov %s1583_s19 }
 0x1de   : > { %p21_p3 = scmp.ge.s32.totalorder %s24_s23, 4   ;;  %s1972_s19 = smov %s1587_s20 }
 0x1df   : > { %s1973_s20 = smov %s1698_s30  ;;  %s1974_s21 = smov %s1595_s22 }
 0x1e0   : > { %s1975_s22 = smov %s1977_s25  ;;  %23 = sbr.rel (!%p21_p3) target bundleno = 8 (0x8), region = 129 }
 0x1e7   :  { %937 = vsyncpa [#allocation4], 1 }
 0x1e8   :  { %939 = vsyncpa [#allocation4 + $0x1], 1 }
 0x1e9   :  { %940 = vsyncpa [#allocation7], 1 }
 0x1ea   :  { %942 = vsyncpa [#allocation7 + $0x1], 1 }
 0x1eb   :  { %943 = vsyncpa [#allocation5], 1 }
 0x1ec   :  { %945 = vsyncpa [#allocation5 + $0x1], 1 }
 0x1ed   :  { %946 = vsyncpa [#allocation11], 1 }

</bundles_post_ra>
